<compile_context>
chip_gen: v7x
topology: tpu7x:2x2x1
jax: 0.10.0
libtpu: 0.0.40
codegen_flags: <defaults>
</compile_context>

<pallas_src>
import functools

import jax
import jax.numpy as jnp
import numpy as np
from jax.experimental import pallas as pl
from jax.experimental.pallas import tpu as pltpu

LANES = 128
SUBLANES = 8
CHUNK_ROWS = 32           # (32, 128) f32 chunk = 4 vregs -> bounded live range per tanh chain
MAX_BLOCK_ROWS = 2048     # (2048, 128) f32 = 1 MiB/buffer; <= ~4 MiB double-buffered in+out
SMALL_N = 1 << 16         # below this, pallas_call fixed cost dominates -> pure XLA path


def _mlp_kernel(w1_ref, b1_ref, w2_ref, b2_ref, x_ref, o_ref, *, hidden: int, chunk_rows: int):
    # x_ref/o_ref: (block_rows, 128) lane-dense tiles in VMEM (x is f32).
    # w1/b1/w2: f32[hidden] in SMEM; b2: f32[1] in SMEM (scalar reads, VPU broadcast).
    n_chunks = x_ref.shape[0] // chunk_rows

    def chunk_body(c):
        r0 = pl.multiple_of(c * chunk_rows, chunk_rows)
        x = x_ref[pl.ds(r0, chunk_rows), :]
        # b2 folded into the first term; statically unrolled H chain of
        # scalar-broadcast FMA (VPU) + tanh (EUP) over a small 4-vreg chunk.
        acc = w2_ref[0] * jnp.tanh(w1_ref[0] * x + b1_ref[0]) + b2_ref[0]
        for h in range(1, hidden):
            acc = acc + w2_ref[h] * jnp.tanh(w1_ref[h] * x + b1_ref[h])
        o_ref[pl.ds(r0, chunk_rows), :] = acc.astype(o_ref.dtype)

    if n_chunks == 1:
        chunk_body(0)
    else:
        @pl.loop(0, n_chunks)
        def _(c):
            chunk_body(c)


def t20_forward(x, w1, b1, w2, b2, *, force_pallas: bool = False):
    """x: (N, 1).  w1: (1, H), b1: (1, H), w2: (H, 1), b2: (1, 1).  Returns (N, 1)."""
    N = x.shape[0]
    H = w1.shape[1]
    out_dtype = x.dtype

    if N < SMALL_N and not force_pallas:
        # Small-N fast path: at the deployed size the math is a handful of FLOPs
        # and the pallas_call launch + layout plumbing would dominate.
        return (jnp.tanh(x @ w1 + b1) @ w2 + b2).astype(out_dtype)

    # --- lane-dense layout: (rows_padded, 128) f32 slab ---
    rows = pl.cdiv(N, LANES)
    # Big blocks (up to 2048 rows) to amortize per-grid-step overhead, but keep the
    # grid length >= 2 whenever there is enough work so the "parallel" axis can be
    # sharded across both v7x TensorCores.
    half = pl.cdiv(rows, 2) if rows >= 2 * CHUNK_ROWS else rows
    block_rows = min(MAX_BLOCK_ROWS, pl.cdiv(half, CHUNK_ROWS) * CHUNK_ROWS)
    rows_padded = pl.cdiv(rows, block_rows) * block_rows
    total = rows_padded * LANES

    x_flat = x.reshape(-1)
    if x_flat.dtype != jnp.float32:
        x_flat = x_flat.astype(jnp.float32)
    if total != N:
        # Only a ragged tail forces a pad copy; aligned N skips this HBM pass entirely.
        x_flat = jnp.pad(x_flat, (0, total - N))
    x_slab = x_flat.reshape(rows_padded, LANES)

    # --- tiny parameters as 1-D f32 arrays in SMEM ---
    w1f = w1.reshape(-1).astype(jnp.float32)   # (H,)
    b1f = b1.reshape(-1).astype(jnp.float32)   # (H,)
    w2f = w2.reshape(-1).astype(jnp.float32)   # (H,)
    b2f = b2.reshape(-1).astype(jnp.float32)   # (1,)

    smem_spec = pl.BlockSpec(memory_space=pltpu.MemorySpace.SMEM)

    out_slab = pl.pallas_call(
        functools.partial(_mlp_kernel, hidden=H, chunk_rows=CHUNK_ROWS if block_rows % CHUNK_ROWS == 0 else block_rows),
        out_shape=jax.ShapeDtypeStruct((rows_padded, LANES), out_dtype),
        grid=(rows_padded // block_rows,),
        in_specs=[
            smem_spec,  # w1
            smem_spec,  # b1
            smem_spec,  # w2
            smem_spec,  # b2
            pl.BlockSpec((block_rows, LANES), lambda i: (i, 0)),  # x slab
        ],
        out_specs=pl.BlockSpec((block_rows, LANES), lambda i: (i, 0)),
        compiler_params=pltpu.CompilerParams(
            dimension_semantics=("parallel",),
        ),
    )(w1f, b1f, w2f, b2f, x_slab)

    # Strip padding (if any) and restore the (N, 1) column layout (dtype already matches).
    out = out_slab.reshape(-1)
    if total != N:
        out = out[:N]
    return out.reshape(N, 1)


def init_params(key, hidden=20, dtype=jnp.float32):
    # Deterministic init mimicking PyTorch Linear default: U(-1/sqrt(fan_in), 1/sqrt(fan_in)).
    k1, k2, k3, k4 = jax.random.split(key, 4)
    bound1 = 1.0 / np.sqrt(1.0)      # fan_in = 1
    bound2 = 1.0 / np.sqrt(hidden)   # fan_in = hidden
    w1 = jax.random.uniform(k1, (1, hidden), dtype, -bound1, bound1)   # (in, out)
    b1 = jax.random.uniform(k2, (1, hidden), dtype, -bound1, bound1)
    w2 = jax.random.uniform(k3, (hidden, 1), dtype, -bound2, bound2)   # (in, out)
    b2 = jax.random.uniform(k4, (1, 1), dtype, -bound2, bound2)
    return w1, b1, w2, b2


if __name__ == "__main__":
    key = jax.random.PRNGKey(0)
    k_x, k_p, k_big = jax.random.split(key, 3)

    H = 20
    w1, b1, w2, b2 = init_params(k_p, hidden=H)

    def ref_fn(xx):
        # Pure-JAX reference: exact same math as the PyTorch module forward.
        return jnp.tanh(xx @ w1 + b1) @ w2 + b2

    # 1) Deployed-size check (N=8): small-N fast path (no pallas dispatch).
    x_small = jax.random.normal(k_x, (8, 1), jnp.float32)
    out_small = jax.block_until_ready(t20_forward(x_small, w1, b1, w2, b2))
    np.testing.assert_allclose(np.asarray(out_small), np.asarray(ref_fn(x_small)),
                               rtol=2e-5, atol=2e-5)

    # 2) Pallas path with a ragged N: exercises tail padding, 32-row chunked inner
    #    loop, and a grid of >= 2 blocks (v7x megacore sharding).
    N = 70_003
    x_big = jax.random.normal(k_big, (N, 1), jnp.float32)
    out_big = jax.block_until_ready(t20_forward(x_big, w1, b1, w2, b2, force_pallas=True))
    np.testing.assert_allclose(np.asarray(out_big), np.asarray(ref_fn(x_big)),
                               rtol=2e-5, atol=2e-5)

    print("KERNEL_OK")
</pallas_src>

<mosaic_0001>
module attributes {stable_mosaic.version = 11 : i64} {
  func.func @_mlp_kernel(%arg0: i32, %arg1: memref<20xf32, #tpu.memory_space<smem>>, %arg2: memref<20xf32, #tpu.memory_space<smem>>, %arg3: memref<20xf32, #tpu.memory_space<smem>>, %arg4: memref<1xf32, #tpu.memory_space<smem>>, %arg5: memref<288x128xf32, #tpu.memory_space<vmem>>, %arg6: memref<288x128xf32, #tpu.memory_space<vmem>>) attributes {dimension_semantics = [#tpu.dimension_semantics<parallel>], iteration_bounds = array<i64: 2>, scalar_prefetch = 0 : i64, scratch_operands = 0 : i64, tpu.core_type = #tpu.core_type<tc>, window_params = [{transform_indices = @transform_0, window_bounds = array<i64: 20>}, {transform_indices = @transform_1, window_bounds = array<i64: 20>}, {transform_indices = @transform_2, window_bounds = array<i64: 20>}, {transform_indices = @transform_3, window_bounds = array<i64: 1>}, {transform_indices = @transform_4, window_bounds = array<i64: 288, 128>}, {transform_indices = @transform_5, window_bounds = array<i64: 288, 128>}]} {
    %c0_i32 = arith.constant 0 : i32
    %c9_i32 = arith.constant 9 : i32
    %0 = arith.addi %c0_i32, %c9_i32 : i32
    %c1_i32 = arith.constant 1 : i32
    scf.for %arg7 = %c0_i32 to %0 step %c1_i32  : i32 {
      %c1_i32_1 = arith.constant 1 : i32
      %1 = arith.muli %arg7, %c1_i32_1 : i32
      %c0_i32_2 = arith.constant 0 : i32
      %2 = arith.addi %c0_i32_2, %1 : i32
      %c32_i32 = arith.constant 32 : i32
      %3 = arith.muli %2, %c32_i32 : i32
      %4 = tpu.assume_multiple %3, 32 : i32
      %5 = arith.index_cast %4 : i32 to index
      %c0 = arith.constant 0 : index
      %6 = vector.load %arg5[%5, %c0] : memref<288x128xf32, #tpu.memory_space<vmem>>, vector<32x128xf32>
      %c0_3 = arith.constant 0 : index
      %7 = memref.load %arg3[%c0_3] : memref<20xf32, #tpu.memory_space<smem>>
      %c0_4 = arith.constant 0 : index
      %8 = memref.load %arg1[%c0_4] : memref<20xf32, #tpu.memory_space<smem>>
      %9 = vector.broadcast %8 : f32 to vector<32x128xf32>
      %10 = arith.mulf %9, %6 : vector<32x128xf32>
      %c0_5 = arith.constant 0 : index
      %11 = memref.load %arg2[%c0_5] : memref<20xf32, #tpu.memory_space<smem>>
      %12 = vector.broadcast %11 : f32 to vector<32x128xf32>
      %13 = arith.addf %10, %12 : vector<32x128xf32>
      %14 = math.tanh %13 : vector<32x128xf32>
      %15 = vector.broadcast %7 : f32 to vector<32x128xf32>
      %16 = arith.mulf %15, %14 : vector<32x128xf32>
      %c0_6 = arith.constant 0 : index
      %17 = memref.load %arg4[%c0_6] : memref<1xf32, #tpu.memory_space<smem>>
      %18 = vector.broadcast %17 : f32 to vector<32x128xf32>
      %19 = arith.addf %16, %18 : vector<32x128xf32>
      %c1 = arith.constant 1 : index
      %20 = memref.load %arg3[%c1] : memref<20xf32, #tpu.memory_space<smem>>
      %c1_7 = arith.constant 1 : index
      %21 = memref.load %arg1[%c1_7] : memref<20xf32, #tpu.memory_space<smem>>
      %22 = vector.broadcast %21 : f32 to vector<32x128xf32>
      %23 = arith.mulf %22, %6 : vector<32x128xf32>
      %c1_8 = arith.constant 1 : index
      %24 = memref.load %arg2[%c1_8] : memref<20xf32, #tpu.memory_space<smem>>
      %25 = vector.broadcast %24 : f32 to vector<32x128xf32>
      %26 = arith.addf %23, %25 : vector<32x128xf32>
      %27 = math.tanh %26 : vector<32x128xf32>
      %28 = vector.broadcast %20 : f32 to vector<32x128xf32>
      %29 = arith.mulf %28, %27 : vector<32x128xf32>
      %30 = arith.addf %19, %29 : vector<32x128xf32>
      %c2 = arith.constant 2 : index
      %31 = memref.load %arg3[%c2] : memref<20xf32, #tpu.memory_space<smem>>
      %c2_9 = arith.constant 2 : index
      %32 = memref.load %arg1[%c2_9] : memref<20xf32, #tpu.memory_space<smem>>
      %33 = vector.broadcast %32 : f32 to vector<32x128xf32>
      %34 = arith.mulf %33, %6 : vector<32x128xf32>
      %c2_10 = arith.constant 2 : index
      %35 = memref.load %arg2[%c2_10] : memref<20xf32, #tpu.memory_space<smem>>
      %36 = vector.broadcast %35 : f32 to vector<32x128xf32>
      %37 = arith.addf %34, %36 : vector<32x128xf32>
      %38 = math.tanh %37 : vector<32x128xf32>
      %39 = vector.broadcast %31 : f32 to vector<32x128xf32>
      %40 = arith.mulf %39, %38 : vector<32x128xf32>
      %41 = arith.addf %30, %40 : vector<32x128xf32>
      %c3 = arith.constant 3 : index
      %42 = memref.load %arg3[%c3] : memref<20xf32, #tpu.memory_space<smem>>
      %c3_11 = arith.constant 3 : index
      %43 = memref.load %arg1[%c3_11] : memref<20xf32, #tpu.memory_space<smem>>
      %44 = vector.broadcast %43 : f32 to vector<32x128xf32>
      %45 = arith.mulf %44, %6 : vector<32x128xf32>
      %c3_12 = arith.constant 3 : index
      %46 = memref.load %arg2[%c3_12] : memref<20xf32, #tpu.memory_space<smem>>
      %47 = vector.broadcast %46 : f32 to vector<32x128xf32>
      %48 = arith.addf %45, %47 : vector<32x128xf32>
      %49 = math.tanh %48 : vector<32x128xf32>
      %50 = vector.broadcast %42 : f32 to vector<32x128xf32>
      %51 = arith.mulf %50, %49 : vector<32x128xf32>
      %52 = arith.addf %41, %51 : vector<32x128xf32>
      %c4 = arith.constant 4 : index
      %53 = memref.load %arg3[%c4] : memref<20xf32, #tpu.memory_space<smem>>
      %c4_13 = arith.constant 4 : index
      %54 = memref.load %arg1[%c4_13] : memref<20xf32, #tpu.memory_space<smem>>
      %55 = vector.broadcast %54 : f32 to vector<32x128xf32>
      %56 = arith.mulf %55, %6 : vector<32x128xf32>
      %c4_14 = arith.constant 4 : index
      %57 = memref.load %arg2[%c4_14] : memref<20xf32, #tpu.memory_space<smem>>
      %58 = vector.broadcast %57 : f32 to vector<32x128xf32>
      %59 = arith.addf %56, %58 : vector<32x128xf32>
      %60 = math.tanh %59 : vector<32x128xf32>
      %61 = vector.broadcast %53 : f32 to vector<32x128xf32>
      %62 = arith.mulf %61, %60 : vector<32x128xf32>
      %63 = arith.addf %52, %62 : vector<32x128xf32>
      %c5 = arith.constant 5 : index
      %64 = memref.load %arg3[%c5] : memref<20xf32, #tpu.memory_space<smem>>
      %c5_15 = arith.constant 5 : index
      %65 = memref.load %arg1[%c5_15] : memref<20xf32, #tpu.memory_space<smem>>
      %66 = vector.broadcast %65 : f32 to vector<32x128xf32>
      %67 = arith.mulf %66, %6 : vector<32x128xf32>
      %c5_16 = arith.constant 5 : index
      %68 = memref.load %arg2[%c5_16] : memref<20xf32, #tpu.memory_space<smem>>
      %69 = vector.broadcast %68 : f32 to vector<32x128xf32>
      %70 = arith.addf %67, %69 : vector<32x128xf32>
      %71 = math.tanh %70 : vector<32x128xf32>
      %72 = vector.broadcast %64 : f32 to vector<32x128xf32>
      %73 = arith.mulf %72, %71 : vector<32x128xf32>
      %74 = arith.addf %63, %73 : vector<32x128xf32>
      %c6 = arith.constant 6 : index
      %75 = memref.load %arg3[%c6] : memref<20xf32, #tpu.memory_space<smem>>
      %c6_17 = arith.constant 6 : index
      %76 = memref.load %arg1[%c6_17] : memref<20xf32, #tpu.memory_space<smem>>
      %77 = vector.broadcast %76 : f32 to vector<32x128xf32>
      %78 = arith.mulf %77, %6 : vector<32x128xf32>
      %c6_18 = arith.constant 6 : index
      %79 = memref.load %arg2[%c6_18] : memref<20xf32, #tpu.memory_space<smem>>
      %80 = vector.broadcast %79 : f32 to vector<32x128xf32>
      %81 = arith.addf %78, %80 : vector<32x128xf32>
      %82 = math.tanh %81 : vector<32x128xf32>
      %83 = vector.broadcast %75 : f32 to vector<32x128xf32>
      %84 = arith.mulf %83, %82 : vector<32x128xf32>
      %85 = arith.addf %74, %84 : vector<32x128xf32>
      %c7 = arith.constant 7 : index
      %86 = memref.load %arg3[%c7] : memref<20xf32, #tpu.memory_space<smem>>
      %c7_19 = arith.constant 7 : index
      %87 = memref.load %arg1[%c7_19] : memref<20xf32, #tpu.memory_space<smem>>
      %88 = vector.broadcast %87 : f32 to vector<32x128xf32>
      %89 = arith.mulf %88, %6 : vector<32x128xf32>
      %c7_20 = arith.constant 7 : index
      %90 = memref.load %arg2[%c7_20] : memref<20xf32, #tpu.memory_space<smem>>
      %91 = vector.broadcast %90 : f32 to vector<32x128xf32>
      %92 = arith.addf %89, %91 : vector<32x128xf32>
      %93 = math.tanh %92 : vector<32x128xf32>
      %94 = vector.broadcast %86 : f32 to vector<32x128xf32>
      %95 = arith.mulf %94, %93 : vector<32x128xf32>
      %96 = arith.addf %85, %95 : vector<32x128xf32>
      %c8 = arith.constant 8 : index
      %97 = memref.load %arg3[%c8] : memref<20xf32, #tpu.memory_space<smem>>
      %c8_21 = arith.constant 8 : index
      %98 = memref.load %arg1[%c8_21] : memref<20xf32, #tpu.memory_space<smem>>
      %99 = vector.broadcast %98 : f32 to vector<32x128xf32>
      %100 = arith.mulf %99, %6 : vector<32x128xf32>
      %c8_22 = arith.constant 8 : index
      %101 = memref.load %arg2[%c8_22] : memref<20xf32, #tpu.memory_space<smem>>
      %102 = vector.broadcast %101 : f32 to vector<32x128xf32>
      %103 = arith.addf %100, %102 : vector<32x128xf32>
      %104 = math.tanh %103 : vector<32x128xf32>
      %105 = vector.broadcast %97 : f32 to vector<32x128xf32>
      %106 = arith.mulf %105, %104 : vector<32x128xf32>
      %107 = arith.addf %96, %106 : vector<32x128xf32>
      %c9 = arith.constant 9 : index
      %108 = memref.load %arg3[%c9] : memref<20xf32, #tpu.memory_space<smem>>
      %c9_23 = arith.constant 9 : index
      %109 = memref.load %arg1[%c9_23] : memref<20xf32, #tpu.memory_space<smem>>
      %110 = vector.broadcast %109 : f32 to vector<32x128xf32>
      %111 = arith.mulf %110, %6 : vector<32x128xf32>
      %c9_24 = arith.constant 9 : index
      %112 = memref.load %arg2[%c9_24] : memref<20xf32, #tpu.memory_space<smem>>
      %113 = vector.broadcast %112 : f32 to vector<32x128xf32>
      %114 = arith.addf %111, %113 : vector<32x128xf32>
      %115 = math.tanh %114 : vector<32x128xf32>
      %116 = vector.broadcast %108 : f32 to vector<32x128xf32>
      %117 = arith.mulf %116, %115 : vector<32x128xf32>
      %118 = arith.addf %107, %117 : vector<32x128xf32>
      %c10 = arith.constant 10 : index
      %119 = memref.load %arg3[%c10] : memref<20xf32, #tpu.memory_space<smem>>
      %c10_25 = arith.constant 10 : index
      %120 = memref.load %arg1[%c10_25] : memref<20xf32, #tpu.memory_space<smem>>
      %121 = vector.broadcast %120 : f32 to vector<32x128xf32>
      %122 = arith.mulf %121, %6 : vector<32x128xf32>
      %c10_26 = arith.constant 10 : index
      %123 = memref.load %arg2[%c10_26] : memref<20xf32, #tpu.memory_space<smem>>
      %124 = vector.broadcast %123 : f32 to vector<32x128xf32>
      %125 = arith.addf %122, %124 : vector<32x128xf32>
      %126 = math.tanh %125 : vector<32x128xf32>
      %127 = vector.broadcast %119 : f32 to vector<32x128xf32>
      %128 = arith.mulf %127, %126 : vector<32x128xf32>
      %129 = arith.addf %118, %128 : vector<32x128xf32>
      %c11 = arith.constant 11 : index
      %130 = memref.load %arg3[%c11] : memref<20xf32, #tpu.memory_space<smem>>
      %c11_27 = arith.constant 11 : index
      %131 = memref.load %arg1[%c11_27] : memref<20xf32, #tpu.memory_space<smem>>
      %132 = vector.broadcast %131 : f32 to vector<32x128xf32>
      %133 = arith.mulf %132, %6 : vector<32x128xf32>
      %c11_28 = arith.constant 11 : index
      %134 = memref.load %arg2[%c11_28] : memref<20xf32, #tpu.memory_space<smem>>
      %135 = vector.broadcast %134 : f32 to vector<32x128xf32>
      %136 = arith.addf %133, %135 : vector<32x128xf32>
      %137 = math.tanh %136 : vector<32x128xf32>
      %138 = vector.broadcast %130 : f32 to vector<32x128xf32>
      %139 = arith.mulf %138, %137 : vector<32x128xf32>
      %140 = arith.addf %129, %139 : vector<32x128xf32>
      %c12 = arith.constant 12 : index
      %141 = memref.load %arg3[%c12] : memref<20xf32, #tpu.memory_space<smem>>
      %c12_29 = arith.constant 12 : index
      %142 = memref.load %arg1[%c12_29] : memref<20xf32, #tpu.memory_space<smem>>
      %143 = vector.broadcast %142 : f32 to vector<32x128xf32>
      %144 = arith.mulf %143, %6 : vector<32x128xf32>
      %c12_30 = arith.constant 12 : index
      %145 = memref.load %arg2[%c12_30] : memref<20xf32, #tpu.memory_space<smem>>
      %146 = vector.broadcast %145 : f32 to vector<32x128xf32>
      %147 = arith.addf %144, %146 : vector<32x128xf32>
      %148 = math.tanh %147 : vector<32x128xf32>
      %149 = vector.broadcast %141 : f32 to vector<32x128xf32>
      %150 = arith.mulf %149, %148 : vector<32x128xf32>
      %151 = arith.addf %140, %150 : vector<32x128xf32>
      %c13 = arith.constant 13 : index
      %152 = memref.load %arg3[%c13] : memref<20xf32, #tpu.memory_space<smem>>
      %c13_31 = arith.constant 13 : index
      %153 = memref.load %arg1[%c13_31] : memref<20xf32, #tpu.memory_space<smem>>
      %154 = vector.broadcast %153 : f32 to vector<32x128xf32>
      %155 = arith.mulf %154, %6 : vector<32x128xf32>
      %c13_32 = arith.constant 13 : index
      %156 = memref.load %arg2[%c13_32] : memref<20xf32, #tpu.memory_space<smem>>
      %157 = vector.broadcast %156 : f32 to vector<32x128xf32>
      %158 = arith.addf %155, %157 : vector<32x128xf32>
      %159 = math.tanh %158 : vector<32x128xf32>
      %160 = vector.broadcast %152 : f32 to vector<32x128xf32>
      %161 = arith.mulf %160, %159 : vector<32x128xf32>
      %162 = arith.addf %151, %161 : vector<32x128xf32>
      %c14 = arith.constant 14 : index
      %163 = memref.load %arg3[%c14] : memref<20xf32, #tpu.memory_space<smem>>
      %c14_33 = arith.constant 14 : index
      %164 = memref.load %arg1[%c14_33] : memref<20xf32, #tpu.memory_space<smem>>
      %165 = vector.broadcast %164 : f32 to vector<32x128xf32>
      %166 = arith.mulf %165, %6 : vector<32x128xf32>
      %c14_34 = arith.constant 14 : index
      %167 = memref.load %arg2[%c14_34] : memref<20xf32, #tpu.memory_space<smem>>
      %168 = vector.broadcast %167 : f32 to vector<32x128xf32>
      %169 = arith.addf %166, %168 : vector<32x128xf32>
      %170 = math.tanh %169 : vector<32x128xf32>
      %171 = vector.broadcast %163 : f32 to vector<32x128xf32>
      %172 = arith.mulf %171, %170 : vector<32x128xf32>
      %173 = arith.addf %162, %172 : vector<32x128xf32>
      %c15 = arith.constant 15 : index
      %174 = memref.load %arg3[%c15] : memref<20xf32, #tpu.memory_space<smem>>
      %c15_35 = arith.constant 15 : index
      %175 = memref.load %arg1[%c15_35] : memref<20xf32, #tpu.memory_space<smem>>
      %176 = vector.broadcast %175 : f32 to vector<32x128xf32>
      %177 = arith.mulf %176, %6 : vector<32x128xf32>
      %c15_36 = arith.constant 15 : index
      %178 = memref.load %arg2[%c15_36] : memref<20xf32, #tpu.memory_space<smem>>
      %179 = vector.broadcast %178 : f32 to vector<32x128xf32>
      %180 = arith.addf %177, %179 : vector<32x128xf32>
      %181 = math.tanh %180 : vector<32x128xf32>
      %182 = vector.broadcast %174 : f32 to vector<32x128xf32>
      %183 = arith.mulf %182, %181 : vector<32x128xf32>
      %184 = arith.addf %173, %183 : vector<32x128xf32>
      %c16 = arith.constant 16 : index
      %185 = memref.load %arg3[%c16] : memref<20xf32, #tpu.memory_space<smem>>
      %c16_37 = arith.constant 16 : index
      %186 = memref.load %arg1[%c16_37] : memref<20xf32, #tpu.memory_space<smem>>
      %187 = vector.broadcast %186 : f32 to vector<32x128xf32>
      %188 = arith.mulf %187, %6 : vector<32x128xf32>
      %c16_38 = arith.constant 16 : index
      %189 = memref.load %arg2[%c16_38] : memref<20xf32, #tpu.memory_space<smem>>
      %190 = vector.broadcast %189 : f32 to vector<32x128xf32>
      %191 = arith.addf %188, %190 : vector<32x128xf32>
      %192 = math.tanh %191 : vector<32x128xf32>
      %193 = vector.broadcast %185 : f32 to vector<32x128xf32>
      %194 = arith.mulf %193, %192 : vector<32x128xf32>
      %195 = arith.addf %184, %194 : vector<32x128xf32>
      %c17 = arith.constant 17 : index
      %196 = memref.load %arg3[%c17] : memref<20xf32, #tpu.memory_space<smem>>
      %c17_39 = arith.constant 17 : index
      %197 = memref.load %arg1[%c17_39] : memref<20xf32, #tpu.memory_space<smem>>
      %198 = vector.broadcast %197 : f32 to vector<32x128xf32>
      %199 = arith.mulf %198, %6 : vector<32x128xf32>
      %c17_40 = arith.constant 17 : index
      %200 = memref.load %arg2[%c17_40] : memref<20xf32, #tpu.memory_space<smem>>
      %201 = vector.broadcast %200 : f32 to vector<32x128xf32>
      %202 = arith.addf %199, %201 : vector<32x128xf32>
      %203 = math.tanh %202 : vector<32x128xf32>
      %204 = vector.broadcast %196 : f32 to vector<32x128xf32>
      %205 = arith.mulf %204, %203 : vector<32x128xf32>
      %206 = arith.addf %195, %205 : vector<32x128xf32>
      %c18 = arith.constant 18 : index
      %207 = memref.load %arg3[%c18] : memref<20xf32, #tpu.memory_space<smem>>
      %c18_41 = arith.constant 18 : index
      %208 = memref.load %arg1[%c18_41] : memref<20xf32, #tpu.memory_space<smem>>
      %209 = vector.broadcast %208 : f32 to vector<32x128xf32>
      %210 = arith.mulf %209, %6 : vector<32x128xf32>
      %c18_42 = arith.constant 18 : index
      %211 = memref.load %arg2[%c18_42] : memref<20xf32, #tpu.memory_space<smem>>
      %212 = vector.broadcast %211 : f32 to vector<32x128xf32>
      %213 = arith.addf %210, %212 : vector<32x128xf32>
      %214 = math.tanh %213 : vector<32x128xf32>
      %215 = vector.broadcast %207 : f32 to vector<32x128xf32>
      %216 = arith.mulf %215, %214 : vector<32x128xf32>
      %217 = arith.addf %206, %216 : vector<32x128xf32>
      %c19 = arith.constant 19 : index
      %218 = memref.load %arg3[%c19] : memref<20xf32, #tpu.memory_space<smem>>
      %c19_43 = arith.constant 19 : index
      %219 = memref.load %arg1[%c19_43] : memref<20xf32, #tpu.memory_space<smem>>
      %220 = vector.broadcast %219 : f32 to vector<32x128xf32>
      %221 = arith.mulf %220, %6 : vector<32x128xf32>
      %c19_44 = arith.constant 19 : index
      %222 = memref.load %arg2[%c19_44] : memref<20xf32, #tpu.memory_space<smem>>
      %223 = vector.broadcast %222 : f32 to vector<32x128xf32>
      %224 = arith.addf %221, %223 : vector<32x128xf32>
      %225 = math.tanh %224 : vector<32x128xf32>
      %226 = vector.broadcast %218 : f32 to vector<32x128xf32>
      %227 = arith.mulf %226, %225 : vector<32x128xf32>
      %228 = arith.addf %217, %227 : vector<32x128xf32>
      %229 = arith.index_cast %4 : i32 to index
      %c0_45 = arith.constant 0 : index
      %230 = vector.load %arg6[%229, %c0_45] : memref<288x128xf32, #tpu.memory_space<vmem>>, vector<32x128xf32>
      tpu.vector_store %arg6[%229, %c0_45], %228 {strides = array<i32>} : memref<288x128xf32, #tpu.memory_space<vmem>>, vector<32x128xf32>,
    }
    %c9_i32_0 = arith.constant 9 : i32
    return
  }
  func.func @transform_0(%arg0: i32) -> i32 {
    %c0_i32 = arith.constant 0 : i32
    %c0_i32_0 = arith.constant 0 : i32
    return %c0_i32 : i32
  }
  func.func @transform_1(%arg0: i32) -> i32 {
    %c0_i32 = arith.constant 0 : i32
    %c0_i32_0 = arith.constant 0 : i32
    return %c0_i32 : i32
  }
  func.func @transform_2(%arg0: i32) -> i32 {
    %c0_i32 = arith.constant 0 : i32
    %c0_i32_0 = arith.constant 0 : i32
    return %c0_i32 : i32
  }
  func.func @transform_3(%arg0: i32) -> i32 {
    %c0_i32 = arith.constant 0 : i32
    %c0_i32_0 = arith.constant 0 : i32
    return %c0_i32 : i32
  }
  func.func @transform_4(%arg0: i32) -> (i32, i32) {
    %c0_i32 = arith.constant 0 : i32
    %c0_i32_0 = arith.constant 0 : i32
    return %arg0, %c0_i32 : i32, i32
  }
  func.func @transform_5(%arg0: i32) -> (i32, i32) {
    %c0_i32 = arith.constant 0 : i32
    %c0_i32_0 = arith.constant 0 : i32
    return %arg0, %c0_i32 : i32, i32
  }
}

</mosaic_0001>

<bundles_post_ra>
// kernel: tpu_custom_call.1
= control target key start
LH: loop header
LB: loop body
LE: loop exit
PB: predicated region body
PF: predicated region fallthrough
CT: control target
= control target key end

     0   :  { %s1993_s0 = inlined_call_operand.vmem [shape: f32[20], index: 0, kind: input, shape index: {}]   ;;  %s1994_s1 = inlined_call_operand.vmem [shape: f32[20], index: 1, kind: input, shape index: {}]   ;;  %s1995_s2 = inlined_call_operand.vmem [shape: f32[20], index: 2, kind: input, shape index: {}]   ;;  %s1996_s3 = inlined_call_operand.<no memory space> [shape: f32[1], index: 3, kind: input, shape index: {}]   ;;  %s1997_s4 = inlined_call_operand.hbm [shape: f32[576,128], index: 4, kind: input, shape index: {}]   ;;  %s1998_s5 = inlined_call_operand.hbm [shape: f32[576,128], index: 5, kind: output, shape index: {}]  }
   0x1   :  { %10 = sst [smem:[#allocation2]] %s1996_s3 }
   0x2   :  { %11 = vsyncpa [#allocation6], 0 }
   0x3   :  { %12 = vsyncpa [#allocation8], 0 }
   0x4   :  { %13 = vsyncpa [#allocation4], 0 }
   0x5   :  { %15 = vsyncpa [#allocation4 + $0x1], 0 }
   0x6   :  { %16 = vsyncpa [#allocation5], 0 }
   0x7   :  { %18 = vsyncpa [#allocation5 + $0x1], 0  ;;  %s1481_s20 = smov 0   ;;  %s1483_s21 = smov 0  }
   0x8   :  { %s1485_s22 = smov 0   ;;  %s1487_s23 = smov 0  }
   0x9 LB: > { %s1502_s3 = sadd.s32 4294967295, %s1433_s23   ;;  %s951_s24 = sadd.s32 4294967294, %s1433_s23   ;;  %s1433_s23 = sphi %s1487_s23, %s2020_s23   ;;  %s1429_s22 = sphi %s1485_s22, %s2019_s22   ;;  %s1425_s21 = sphi %s1483_s21, %s2018_s21   ;;  %s1421_s20 = sphi %s1481_s20, %s2017_s20  }
   0xa   : > { %p128_p0 = scmp.ne.s32.totalorder %s1425_s21, %s1421_s20  ;;  %p1999_p1 = scmp.eq.s32.totalorder %s1502_s3, 0 }
   0xb   : > { %p158_p3 = scmp.eq.s32.totalorder %s951_s24, 1  ;;  %p952_p5 = scmp.ge.s32.totalorder %s1433_s23, 1 }
   0xc   : > { %p1511_p4 = por %p1999_p1, %p128_p0  ;;  %p165_p7 = scmp.lt.s32.totalorder %s1433_s23, 3 }
   0xd   : > { %p1516_p6 = por %p158_p3, %p128_p0  ;;  %s189_s29 = sshll.u32 %s1994_s1, 4  ;;  %s190_s29 = int_to_ptr.vmem [resolvable:$true] %s189_s29 }
   0xe   : > { %s2002_s25 = scalar_select %p1511_p4, 1, 0 }
   0xf   : > { %s2003_s26 = scalar_select %p1516_p6, 1, 0 }
  0x10   : > { %p1524_p8 = pnand %p952_p5, %p165_p7  ;;  %s178_s8 = sshll.u32 %s1993_s0, 4  ;;  %s179_s8 = int_to_ptr.vmem [resolvable:$true] %s178_s8 }
  0x11   : > { %s200_s12 = sshll.u32 %s1995_s2, 4  ;;  %s1280_s13 = scalar_lea.vmem %s190_s29, 16  ;;  %s1543_s12 = int_to_ptr.vmem [resolvable:$true] %s200_s12 }
  0x12   : > { %s2004_s30 = scalar_select %p1524_p8, 1, 0 }
  0x13   : > { %p1043_p10 = pneg %p1524_p8  ;;  %p1281_p12 = scmp.ne.s32.totalorder %s190_s29, %s1280_s13 }
  0x14   : > { %p1288_p5 = scmp.lt.s32.totalorder %s190_s29, %s190_s29  ;;  %p1289_p7 = scmp.lt.s32.totalorder %s1280_s13, %s1280_s13 }
  0x15   : > { %p1536_p11 = pnand %p1043_p10, %p1999_p1 }
  0x16   : > { %p1290_p10 = por %p1289_p7, %p1288_p5 }
  0x17   : > { %p1282_p13 = pneg %p1536_p11 }
  0x19   : > { %p1283_p0 = pnand %p1282_p13, %p1281_p12 }
  0x1b   : > { %p1284_p3 = pneg %p1283_p0 }
  0x1d   : > { %p1291_p9 = pnand %p1290_p10, %p1284_p3 }
  0x1f   : > { %1294 = shalt.err (!%p1291_p9)
}
  0x20   : > { %s1439_s14 = smov [#allocation7]   ;;  %s1295_s15 = scalar_lea.vmem %s179_s8, 16 }
  0x21   : > { %1049 = dma.vmem_to_smem (!%p1536_p11), %s190_s29, 16, %s1439_s14, [#allocation8]  }
  0x22   : > { %p1296_p1 = scmp.ne.s32.totalorder %s179_s8, %s1295_s15  ;;  %p1303_p4 = scmp.lt.s32.totalorder %s179_s8, %s179_s8 }
  0x23   : > { %p1304_p8 = scmp.lt.s32.totalorder %s1295_s15, %s1295_s15 }
  0x24   : > { %p1298_p2 = pnand %p1296_p1, %p1282_p13 }
  0x25   : > { %p1305_p12 = por %p1304_p8, %p1303_p4 }
  0x26   : > { %p1299_p6 = pneg %p1298_p2 }
  0x28   : > { %p1306_p0 = pnand %p1305_p12, %p1299_p6 }
  0x2a   : > { %1309 = shalt.err (!%p1306_p0)
}
  0x2b   : > { %s1440_s16 = smov [#allocation3]   ;;  %s1310_s17 = scalar_lea.vmem %s1543_s12, 16 }
  0x2c   : > { %1046 = dma.vmem_to_smem (!%p1536_p11), %s179_s8, 16, %s1440_s16, [#allocation6]  }
  0x2d   : > { %p1311_p9 = scmp.ne.s32.totalorder %s1543_s12, %s1310_s17  ;;  %p1318_p2 = scmp.lt.s32.totalorder %s1543_s12, %s1543_s12 }
  0x2e   : > { %p1319_p5 = scmp.lt.s32.totalorder %s1310_s17, %s1310_s17 }
  0x2f   : > { %p1313_p3 = pnand %p1311_p9, %p1282_p13 }
  0x30   : > { %p1320_p4 = por %p1319_p5, %p1318_p2 }
  0x31   : > { %p1314_p1 = pneg %p1313_p3 }
  0x33   : > { %p1321_p6 = pnand %p1320_p4, %p1314_p1 }
  0x35   : > { %1324 = shalt.err (!%p1321_p6)
}
  0x36   : > { %s1441_s18 = smov [#allocation9]   ;;  %s1568_s19 = sadd.s32 1, %s1433_s23  }
  0x37   : > { %1052 = dma.vmem_to_smem (!%p1536_p11), %s1543_s12, 16, %s1441_s18, [#allocation8]  }
  0x38   : > { %s112_s24 = ssub.s32 %s1433_s23, %s1568_s19  ;;  %s115_s27 = sadd.s32 1, %s1429_s22 }
  0x39   : > { %p113_p8 = scmp.eq.s32.totalorder %s112_s24, 0  ;;  %p122_p13 = scmp.ne.s32.totalorder %s1429_s22, %s1425_s21 }
  0x3a   : > { %p123_p7 = scmp.eq.s32.totalorder %s1433_s23, 0  ;;  %p1064_p10 = scmp.lt.s32.totalorder %s1433_s23, 2 }
  0x3b   : > { %s1578_s28 = scalar_select %p113_p8, %s1429_s22, %s115_s27  }
  0x3c   : > { %p124_p12 = por %p123_p7, %p122_p13  ;;  %p2006_p0 = scmp.eq.s32.totalorder %s1502_s3, 1 }
  0x3d   : > { %s214_s6 = sand.u32 1, %s1429_s22   ;;  %s1023_s7 = smul.u32 4608, %s1433_s23 }
  0x3e   : > { %p1582_p9 = por %p2006_p0, %p122_p13  ;;  %s1025_s8 = smul.u32 288, %s214_s6 }
  0x3f   : > { %s1591_s11 = scalar_lea.hbm %s1997_s4, %s1023_s7  ;;  %p1593_p11 = pnand %p1064_p10, %p124_p12 }
  0x40   : > { %s218_s13 = scalar_lea.vmem [#allocation10], %s1025_s8  ;;  %s1599_s15 = scalar_lea.sflag [#allocation4], %s214_s6 }
  0x41   : > { %s225_s14 = sshll.u32 %s218_s13, 4  ;;  %s1325_s16 = scalar_lea.hbm %s1591_s11, 4608  ;;  %s1597_s14 = int_to_ptr.vmem [resolvable:$true] %s225_s14 }
  0x42   : > { %p1326_p3 = scmp.ne.s32.totalorder %s1591_s11, %s1325_s16  ;;  %p1327_p1 = pneg %p1593_p11 }
  0x43   : > { %s1330_s24 = scalar_lea.hbm %s1997_s4, 9216  ;;  %p1331_p4 = scmp.lt.u32.totalorder %s1591_s11, %s1997_s4 }
  0x44   : > { %p1328_p2 = pnand %p1327_p1, %p1326_p3  ;;  %p1332_p6 = scmp.lt.u32.totalorder %s1330_s24, %s1325_s16 }
  0x45   : > { %p1334_p13 = scmp.lt.u32.totalorder %s1325_s16, %s1591_s11 }
  0x46   : > { %p1329_p5 = pneg %p1328_p2  ;;  %p1333_p8 = por %p1332_p6, %p1331_p4 }
  0x48   : > { %p1335_p7 = por %p1334_p13, %p1333_p8 }
  0x4a   : > { %p1336_p10 = pnand %p1335_p7, %p1329_p5 }
  0x4c   : > { %1339 = shalt.err (!%p1336_p10)
}
  0x4d   : > { %s1340_s6 = scalar_lea.vmem %s1597_s14, 4608  ;;  %s1442_s8 = smov [#allocation10]  }
  0x4e   : > { %p1341_p12 = scmp.ne.s32.totalorder %s1597_s14, %s1340_s6  ;;  %s1345_s9 = sshll.u32 %s1442_s8, 4  ;;  %s1346_s9 = int_to_ptr.vmem [resolvable:$false] %s1345_s9 }
  0x4f   : > { %s1347_s10 = scalar_lea.vmem %s1346_s9, 9216  ;;  %p1348_p2 = scmp.lt.s32.totalorder %s1597_s14, %s1346_s9 }
  0x50   : > { %p1343_p0 = pnand %p1341_p12, %p1327_p1  ;;  %p1349_p4 = scmp.lt.s32.totalorder %s1347_s10, %s1340_s6 }
  0x52   : > { %p1344_p3 = pneg %p1343_p0  ;;  %p1350_p6 = por %p1349_p4, %p1348_p2 }
  0x54   : > { %p1351_p8 = pnand %p1350_p6, %p1344_p3 }
  0x56   : > { %1354 = shalt.err (!%p1351_p8)
}
  0x57   : > { %s1443_s13 = smov 128   ;;  %s1444_s16 = smov 8  }
  0x58   : > { %1056 = dma.hbm_to_vmem [thread:$0]  (!%p1593_p11), %s1591_s11, 4608, %s1597_s14, %s1599_s15, %s1443_s13, %s1443_s13, %s1444_s16  }
  0x59   : > { %p2009_p1 = scmp.ne.s32.totalorder %s2004_s30, 0 }
  0x5a   : > { %p2010_p5 = scmp.eq.s32.totalorder (!%p2009_p1), %s1502_s3, 0 }
  0x5b   : > { %237 = sbr.rel (%p2009_p1) target bundleno = 257 (0x101), region = 40 }
  0x62   : > { %1404 = dma.done.wait (%p2010_p5), [#allocation6], 16   ;;  %p2011_p13 = pmov %p2010_p5 }
  0x63   : > { %p2012_p7 = pmov %p2010_p5 }
  0x64   : > { %1406 = vsyncadd (%p2011_p13), [#allocation6], 4294967280 }
  0x65   : > { %1408 = dma.done.wait (%p2012_p7), [#allocation8], 32   ;;  %p2013_p10 = pmov %p2010_p5 }
  0x66   : > { %s1638_s17 = sand.u32 1, %s1425_s21   ;;  %p2014_p11 = scmp.ne.s32.totalorder %s2002_s25, 0 }
  0x67   : > { %1410 = vsyncadd (%p2013_p10), [#allocation8], 4294967264  ;;  %s1026_s30 = smul.u32 288, %s1638_s17  ;;  %s252_s11 = scalar_lea.sflag [#allocation4], %s1638_s17 }
  0x69   : > { %s1642_s12 = scalar_lea.vmem [#allocation10], %s1026_s30 }
  0x6a   : > { %1412 = dma.done.wait (%p2014_p11), %s252_s11, 4608  }
  0x6b   : > { %1414 = vsyncadd (%p2014_p11), %s252_s11, 4294962688 }
  0x6c   : > { %260 = sfence }
  0x6d   : > { %s1648_s14 = scalar_lea.vmem [#allocation11], %s1026_s30  ;;  %s1650_s15 = smov 0  }
  0x6e LB: >> { %s298_s18 = sld [smem:[#allocation3]]  ;;  %s962_s24 = sshll.u32 %s1437_s15, 5  ;;  %s1437_s15 = sphi %s1650_s15, %s290_s15  }
  0x6f   : >> { %s304_s27 = sld [smem:[#allocation7]]  ;;  %s1659_s7 = scalar_lea.vmem %s1642_s12, %s962_s24 [#allocation10] }
  0x70   : >> { %v1662_v0 = vld [vmem:[%s1659_s7] sm:$0xff]  ;;  %v1665_v1 = vld [vmem:[%s1659_s7 + $0x8] sm:$0xff]  ;;  %v1668_v2 = vld [vmem:[%s1659_s7 + $0x10] sm:$0xff]  ;;  %s964_s25 = sld [smem:[#allocation3 + $0x1]]  ;;  %s967_s8 = sld [smem:[#allocation3 + $0x2]] }
  0x71   : >> { %v1671_v3 = vld [vmem:[%s1659_s7 + $0x18] sm:$0xff]  ;;  %s965_s6 = sld [smem:[#allocation7 + $0x1]]  ;;  %s968_s9 = sld [smem:[#allocation7 + $0x2]] }
  0x72   : >> { %s1673_s10 = sld [smem:[#allocation9]]  ;;  %s1679_s13 = sld [smem:[#allocation3 + $0x3]] }
  0x73   : >> { %s1681_s16 = sld [smem:[#allocation2]]  ;;  %s1686_s30 = sld [smem:[#allocation7 + $0x3]] }
  0x74   : >> { %v299_v4 = vstv %s298_s18  ;;  %s1688_s11 = sld [smem:[#allocation3 + $0x4]]  ;;  %s1690_s18 = sld [smem:[#allocation9 + $0x1]] }
  0x75   : >> { %v300_v5 = vmul.f32 %v299_v4, %v1662_v0  ;;  %v301_v6 = vmul.f32 %v299_v4, %v1665_v1  ;;  %v302_v7 = vmul.f32 %v299_v4, %v1668_v2  ;;  %v303_v8 = vmul.f32 %v299_v4, %v1671_v3  ;;  %s290_s15 = sadd.s32 1, %s1437_s15  }
  0x76   : >> { %v305_v9 = vstv %s304_s27  ;;  %v327_v14 = vstv %s964_s25  ;;  %v353_v20 = vstv %s967_s8  ;;  %s1698_s27 = sld [smem:[#allocation7 + $0x4]]  ;;  %s1700_s25 = sld [smem:[#allocation9 + $0x2]] }
  0x77   : >> { %v306_v10 = vadd.f32 %v305_v9, %v300_v5  ;;  %v307_v11 = vadd.f32 %v305_v9, %v301_v6  ;;  %v308_v12 = vadd.f32 %v305_v9, %v302_v7  ;;  %v309_v13 = vadd.f32 %v305_v9, %v303_v8  ;;  %s1713_s8 = sld [smem:[#allocation3 + $0x5]]  ;;  %p287_p12 = scmp.ge.s32.totalorder %s290_s15, 9  }
  0x78   : >> { %v333_v15 = vstv %s965_s6  ;;  %v328_v16 = vmul.f32 %v327_v14, %v1662_v0  ;;  %v329_v17 = vmul.f32 %v327_v14, %v1665_v1  ;;  %v330_v18 = vmul.f32 %v327_v14, %v1668_v2  ;;  %s1703_s6 = sld [smem:[#allocation9 + $0x3]]  ;;  %s1445_s12 = smov (%p287_p12), [#allocation11]  }
  0x79   : >> { %1116 = vtanh.f32 %v306_v10  ;;  %v331_v19 = vmul.f32 %v327_v14, %v1671_v3  ;;  %v359_v21 = vstv %s968_s9  ;;  %v354_v26 = vmul.f32 %v353_v20, %v1662_v0  ;;  %s1721_s9 = sld [smem:[#allocation9 + $0x4]]  ;;  %s1359_s15 = sshll.u32 (%p287_p12), %s1445_s12, 4  ;;  %s1360_s15 = int_to_ptr.vmem [resolvable:$false] %s1359_s15 }
  0x7a   : >> { %1118 = vtanh.f32 %v307_v11  ;;  %v334_v22 = vadd.f32 %v333_v15, %v328_v16  ;;  %v335_v23 = vadd.f32 %v333_v15, %v329_v17  ;;  %v336_v24 = vadd.f32 %v333_v15, %v330_v18 }
  0x7b   : >> { %1120 = vtanh.f32 %v308_v12  ;;  %v337_v25 = vadd.f32 %v333_v15, %v331_v19  ;;  %v355_v27 = vmul.f32 %v353_v20, %v1665_v1  ;;  %v314_v28 = vstv %s1673_s10  ;;  %s1723_s10 = sld [smem:[#allocation7 + $0x5]] }
  0x7c   : >> { %1122 = vtanh.f32 %v309_v13  ;;  %v356_v29 = vmul.f32 %v353_v20, %v1668_v2  ;;  %v357_v30 = vmul.f32 %v353_v20, %v1671_v3  ;;  %v360_v31 = vadd.f32 %v359_v21, %v354_v26 }
  0x7d   : >> { %1124 = vtanh.f32 %v334_v22  ;;  %v361_v32 = vadd.f32 %v359_v21, %v355_v27  ;;  %v379_v33 = vstv %s1679_s13  ;;  %v320_v40 = vstv %s1681_s16  ;;  %s1728_s13 = sld [smem:[#allocation3 + $0x6]] }
  0x7e   : >> { %1126 = vtanh.f32 %v335_v23  ;;  %v362_v34 = vadd.f32 %v359_v21, %v356_v29  ;;  %v363_v35 = vadd.f32 %v359_v21, %v357_v30  ;;  %v380_v36 = vmul.f32 %v379_v33, %v1662_v0  ;;  %s1735_s16 = sld [smem:[#allocation7 + $0x6]] }
  0x7f   : >> { %1128 = vtanh.f32 %v336_v24  ;;  %v381_v37 = vmul.f32 %v379_v33, %v1665_v1  ;;  %v382_v38 = vmul.f32 %v379_v33, %v1668_v2  ;;  %v383_v39 = vmul.f32 %v379_v33, %v1671_v3 }
  0x80   : >> { %1130 = vtanh.f32 %v337_v25  ;;  %v385_v41 = vstv %s1686_s30  ;;  %v405_v42 = vstv %s1688_s11  ;;  %v342_v43 = vstv %s1690_s18  ;;  %s1738_s30 = sld [smem:[#allocation9 + $0x5]]  ;;  %s1742_s11 = sld [smem:[#allocation3 + $0x7]] }
  0x81   : >> { %1132 = vtanh.f32 %v360_v31  ;;  %v386_v44 = vadd.f32 %v385_v41, %v380_v36  ;;  %v387_v45 = vadd.f32 %v385_v41, %v381_v37  ;;  %v388_v47 = vadd.f32 %v385_v41, %v382_v38  ;;  %s1748_s18 = sld [smem:[#allocation7 + $0x7]] }
  0x82   : >> { %1134 = vtanh.f32 %v361_v32  ;;  %v406_v48 = vmul.f32 %v405_v42, %v1662_v0  ;;  %v407_v49 = vmul.f32 %v405_v42, %v1665_v1  ;;  %v389_v52 = vadd.f32 %v385_v41, %v383_v39 }
  0x83   : >> { %v1117_v46 = vpop.eup %1116  ;;  %1136 = vtanh.f32 %v362_v34  ;;  %v408_v53 = vmul.f32 %v405_v42, %v1668_v2  ;;  %v409_v56 = vmul.f32 %v405_v42, %v1671_v3  ;;  %v411_v57 = vstv %s1698_s27  ;;  %s1753_s27 = sld [smem:[#allocation3 + $0x8]] }
  0x84   : >> { %v1119_v50 = vpop.eup %1118  ;;  %v315_v51 = vmul.f32 %v1117_v46, %v314_v28  ;;  %1138 = vtanh.f32 %v363_v35  ;;  %v368_v60 = vstv %s1700_s25  ;;  %v412_v61 = vadd.f32 %v411_v57, %v406_v48  ;;  %s1758_s25 = sld [smem:[#allocation9 + $0x6]] }
  0x85   : >> { %v1121_v54 = vpop.eup %1120  ;;  %v316_v55 = vmul.f32 %v1119_v50, %v314_v28  ;;  %1140 = vtanh.f32 %v386_v44  ;;  %v1726_v4 = vstv %s1703_s6  ;;  %v413_v5 = vadd.f32 %v411_v57, %v407_v49  ;;  %s1760_s6 = sld [smem:[#allocation9 + $0x7]] }
  0x86   : >> { %v1123_v58 = vpop.eup %1122  ;;  %v317_v59 = vmul.f32 %v1121_v54, %v314_v28  ;;  %1142 = vtanh.f32 %v387_v45  ;;  %v321_v7 = vadd.f32 %v320_v40, %v315_v51  ;;  %v414_v9 = vadd.f32 %v411_v57, %v408_v53 }
  0x87   : >> { %v1125_v62 = vpop.eup %1124  ;;  %v318_v63 = vmul.f32 %v1123_v58, %v314_v28  ;;  %1144 = vtanh.f32 %v388_v47  ;;  %v322_v11 = vadd.f32 %v320_v40, %v316_v55  ;;  %v415_v13 = vadd.f32 %v411_v57, %v409_v56 }
  0x88   : >> { %v1127_v6 = vpop.eup %1126  ;;  %v343_v8 = vmul.f32 %v1125_v62, %v342_v43  ;;  %1146 = vtanh.f32 %v389_v52  ;;  %v323_v15 = vadd.f32 %v320_v40, %v317_v59  ;;  %v431_v17 = vstv %s1713_s8  ;;  %s1763_s8 = sld [smem:[#allocation7 + $0x8]] }
  0x89   : >> { %v1129_v10 = vpop.eup %1128  ;;  %v344_v12 = vmul.f32 %v1127_v6, %v342_v43  ;;  %1148 = vtanh.f32 %v412_v61  ;;  %v324_v19 = vadd.f32 %v320_v40, %v318_v63  ;;  %v432_v21 = vmul.f32 %v431_v17, %v1662_v0 }
  0x8a   : >> { %v1131_v14 = vpop.eup %1130  ;;  %v345_v16 = vmul.f32 %v1129_v10, %v342_v43  ;;  %1150 = vtanh.f32 %v413_v5  ;;  %v347_v23 = vadd.f32 %v343_v8, %v321_v7  ;;  %v433_v25 = vmul.f32 %v431_v17, %v1665_v1 }
  0x8b   : >> { %v1133_v18 = vpop.eup %1132  ;;  %v346_v20 = vmul.f32 %v1131_v14, %v342_v43  ;;  %1152 = vtanh.f32 %v414_v9  ;;  %v348_v27 = vadd.f32 %v344_v12, %v322_v11  ;;  %v434_v29 = vmul.f32 %v431_v17, %v1668_v2 }
  0x8c   : >> { %v1135_v22 = vpop.eup %1134  ;;  %v369_v24 = vmul.f32 %v1133_v18, %v368_v60  ;;  %1154 = vtanh.f32 %v415_v13  ;;  %v435_v30 = vmul.f32 %v431_v17, %v1671_v3  ;;  %v349_v32 = vadd.f32 %v345_v16, %v323_v15 }
  0x8d   : >> { %v1137_v26 = vpop.eup %1136  ;;  %v370_v28 = vmul.f32 %v1135_v22, %v368_v60  ;;  %v420_v34 = vstv %s1721_s9  ;;  %v437_v35 = vstv %s1723_s10  ;;  %v350_v37 = vadd.f32 %v346_v20, %v324_v19  ;;  %s1770_s9 = sld [smem:[#allocation3 + $0x9]] }
  0x8e   : >> { %v1139_v31 = vpop.eup %1138  ;;  %v371_v33 = vmul.f32 %v1137_v26, %v368_v60  ;;  %v438_v39 = vadd.f32 %v437_v35, %v432_v21  ;;  %v439_v40 = vadd.f32 %v437_v35, %v433_v25  ;;  %v373_v42 = vadd.f32 %v369_v24, %v347_v23  ;;  %s1772_s10 = sld [smem:[#allocation7 + $0x9]] }
  0x8f   : >> { %v1141_v36 = vpop.eup %1140  ;;  %v372_v38 = vmul.f32 %v1139_v31, %v368_v60  ;;  %v440_v44 = vadd.f32 %v437_v35, %v434_v29  ;;  %v441_v45 = vadd.f32 %v437_v35, %v435_v30  ;;  %v374_v47 = vadd.f32 %v370_v28, %v348_v27 }
  0x90   : >> { %v1143_v41 = vpop.eup %1142  ;;  %v395_v43 = vmul.f32 %v1141_v36, %v1726_v4  ;;  %1156 = vtanh.f32 %v438_v39  ;;  %v457_v49 = vstv %s1728_s13  ;;  %v375_v51 = vadd.f32 %v371_v33, %v349_v32  ;;  %s1784_s13 = sld [smem:[#allocation3 + $0xa]] }
  0x91   : >> { %v1145_v46 = vpop.eup %1144  ;;  %v396_v48 = vmul.f32 %v1143_v41, %v1726_v4  ;;  %1158 = vtanh.f32 %v439_v40  ;;  %v458_v53 = vmul.f32 %v457_v49, %v1662_v0  ;;  %v376_v55 = vadd.f32 %v372_v38, %v350_v37 }
  0x92   : >> { %v1147_v50 = vpop.eup %1146  ;;  %v397_v52 = vmul.f32 %v1145_v46, %v1726_v4  ;;  %1160 = vtanh.f32 %v440_v44  ;;  %v459_v57 = vmul.f32 %v457_v49, %v1665_v1  ;;  %v399_v59 = vadd.f32 %v395_v43, %v373_v42 }
  0x93   : >> { %v1149_v54 = vpop.eup %1148  ;;  %v398_v56 = vmul.f32 %v1147_v50, %v1726_v4  ;;  %1162 = vtanh.f32 %v441_v45  ;;  %v460_v61 = vmul.f32 %v457_v49, %v1668_v2  ;;  %v400_v63 = vadd.f32 %v396_v48, %v374_v47 }
  0x94   : >> { %v1151_v58 = vpop.eup %1150  ;;  %v421_v60 = vmul.f32 %v1149_v54, %v420_v34  ;;  %v461_v6 = vmul.f32 %v457_v49, %v1671_v3  ;;  %v463_v7 = vstv %s1735_s16  ;;  %v401_v8 = vadd.f32 %v397_v52, %v375_v51  ;;  %s1786_s16 = sld [smem:[#allocation9 + $0x8]] }
  0x95   : >> { %v1153_v62 = vpop.eup %1152  ;;  %v422_v5 = vmul.f32 %v1151_v58, %v420_v34  ;;  %v446_v9 = vstv %s1738_s30  ;;  %v464_v10 = vadd.f32 %v463_v7, %v458_v53  ;;  %v465_v11 = vadd.f32 %v463_v7, %v459_v57  ;;  %s1792_s30 = sld [smem:[#allocation7 + $0xa]] }
  0x96   : >> { %v1155_v4 = vpop.eup %1154  ;;  %v402_v12 = vadd.f32 %v398_v56, %v376_v55  ;;  %v423_v13 = vmul.f32 %v1153_v62, %v420_v34  ;;  %v466_v14 = vadd.f32 %v463_v7, %v460_v61  ;;  %v467_v15 = vadd.f32 %v463_v7, %v461_v6 }
  0x97   : >> { %v424_v16 = vmul.f32 %v1155_v4, %v420_v34  ;;  %v425_v17 = vadd.f32 %v421_v60, %v399_v59  ;;  %1164 = vtanh.f32 %v464_v10  ;;  %v483_v18 = vstv %s1742_s11  ;;  %s1796_s11 = sld [smem:[#allocation3 + $0xb]] }
  0x98   : >> { %v426_v19 = vadd.f32 %v422_v5, %v400_v63  ;;  %1166 = vtanh.f32 %v465_v11  ;;  %v484_v20 = vmul.f32 %v483_v18, %v1662_v0  ;;  %v485_v21 = vmul.f32 %v483_v18, %v1665_v1 }
  0x99   : >> { %1168 = vtanh.f32 %v466_v14  ;;  %v486_v22 = vmul.f32 %v483_v18, %v1668_v2  ;;  %v487_v23 = vmul.f32 %v483_v18, %v1671_v3  ;;  %v489_v24 = vstv %s1748_s18  ;;  %s1800_s18 = sld [smem:[#allocation7 + $0xb]] }
  0x9a   : >> { %v1157_v25 = vpop.eup %1156  ;;  %v427_v26 = vadd.f32 %v423_v13, %v401_v8  ;;  %1170 = vtanh.f32 %v467_v15  ;;  %v490_v27 = vadd.f32 %v489_v24, %v484_v20  ;;  %v491_v28 = vadd.f32 %v489_v24, %v485_v21 }
  0x9b   : >> { %v1159_v29 = vpop.eup %1158  ;;  %v447_v30 = vmul.f32 %v1157_v25, %v446_v9  ;;  %v492_v31 = vadd.f32 %v489_v24, %v486_v22  ;;  %v493_v32 = vadd.f32 %v489_v24, %v487_v23  ;;  %v509_v33 = vstv %s1753_s27  ;;  %s1803_s27 = sld [smem:[#allocation9 + $0x9]] }
  0x9c   : >> { %v1161_v34 = vpop.eup %1160  ;;  %v448_v35 = vmul.f32 %v1159_v29, %v446_v9  ;;  %1172 = vtanh.f32 %v490_v27  ;;  %v510_v36 = vmul.f32 %v509_v33, %v1662_v0  ;;  %v511_v37 = vmul.f32 %v509_v33, %v1665_v1 }
  0x9d   : >> { %v1163_v38 = vpop.eup %1162  ;;  %v449_v39 = vmul.f32 %v1161_v34, %v446_v9  ;;  %v472_v40 = vstv %s1758_s25  ;;  %1174 = vtanh.f32 %v491_v28  ;;  %v512_v41 = vmul.f32 %v509_v33, %v1668_v2  ;;  %s1814_s25 = sld [smem:[#allocation3 + $0xc]] }
  0x9e   : >> { %v428_v42 = vadd.f32 %v424_v16, %v402_v12  ;;  %1176 = vtanh.f32 %v492_v31  ;;  %v1780_v43 = vstv %s1760_s6  ;;  %v513_v44 = vmul.f32 %v509_v33, %v1671_v3  ;;  %s1820_s6 = sld [smem:[#allocation7 + $0xc]] }
  0x9f   : >> { %v450_v45 = vmul.f32 %v1163_v38, %v446_v9  ;;  %v451_v46 = vadd.f32 %v447_v30, %v425_v17  ;;  %1178 = vtanh.f32 %v493_v32  ;;  %v515_v47 = vstv %s1763_s8  ;;  %s1822_s8 = sld [smem:[#allocation9 + $0xa]] }
  0xa0   : >> { %v452_v48 = vadd.f32 %v448_v35, %v426_v19  ;;  %v516_v49 = vadd.f32 %v515_v47, %v510_v36  ;;  %v517_v50 = vadd.f32 %v515_v47, %v511_v37  ;;  %v518_v51 = vadd.f32 %v515_v47, %v512_v41 }
  0xa1   : >> { %v1165_v52 = vpop.eup %1164  ;;  %v453_v53 = vadd.f32 %v449_v39, %v427_v26  ;;  %v519_v54 = vadd.f32 %v515_v47, %v513_v44  ;;  %v535_v55 = vstv %s1770_s9  ;;  %v541_v56 = vstv %s1772_s10  ;;  %s1825_s9 = sld [smem:[#allocation3 + $0xd]] }
  0xa2   : >> { %v1167_v57 = vpop.eup %1166  ;;  %v473_v58 = vmul.f32 %v1165_v52, %v472_v40  ;;  %1180 = vtanh.f32 %v516_v49  ;;  %v536_v59 = vmul.f32 %v535_v55, %v1662_v0  ;;  %v537_v60 = vmul.f32 %v535_v55, %v1665_v1  ;;  %s1828_s10 = sld [smem:[#allocation7 + $0xd]] }
  0xa3   : >> { %v1169_v61 = vpop.eup %1168  ;;  %v474_v62 = vmul.f32 %v1167_v57, %v472_v40  ;;  %1182 = vtanh.f32 %v517_v50  ;;  %v538_v63 = vmul.f32 %v535_v55, %v1668_v2  ;;  %v539_v5 = vmul.f32 %v535_v55, %v1671_v3 }
  0xa4   : >> { %v1171_v6 = vpop.eup %1170  ;;  %v454_v7 = vadd.f32 %v450_v45, %v428_v42  ;;  %v475_v4 = vmul.f32 %v1169_v61, %v472_v40  ;;  %1184 = vtanh.f32 %v518_v51  ;;  %v542_v8 = vadd.f32 %v541_v56, %v536_v59 }
  0xa5   : >> { %v476_v9 = vmul.f32 %v1171_v6, %v472_v40  ;;  %v477_v10 = vadd.f32 %v473_v58, %v451_v46  ;;  %1186 = vtanh.f32 %v519_v54  ;;  %v543_v11 = vadd.f32 %v541_v56, %v537_v60 }
  0xa6   : >> { %v1173_v12 = vpop.eup %1172  ;;  %v478_v13 = vadd.f32 %v474_v62, %v452_v48  ;;  %v544_v14 = vadd.f32 %v541_v56, %v538_v63  ;;  %v545_v15 = vadd.f32 %v541_v56, %v539_v5  ;;  %1188 = vtanh.f32 %v542_v8 }
  0xa7   : >> { %v1175_v16 = vpop.eup %1174  ;;  %v479_v17 = vadd.f32 %v475_v4, %v453_v53  ;;  %v499_v18 = vmul.f32 %v1173_v12, %v1780_v43  ;;  %1190 = vtanh.f32 %v543_v11  ;;  %v561_v19 = vstv %s1784_s13  ;;  %s1831_s13 = sld [smem:[#allocation9 + $0xb]] }
  0xa8   : >> { %v1177_v20 = vpop.eup %1176  ;;  %v500_v21 = vmul.f32 %v1175_v16, %v1780_v43  ;;  %1192 = vtanh.f32 %v544_v14  ;;  %v562_v22 = vmul.f32 %v561_v19, %v1662_v0  ;;  %v563_v23 = vmul.f32 %v561_v19, %v1665_v1 }
  0xa9   : >> { %v1179_v24 = vpop.eup %1178  ;;  %v501_v25 = vmul.f32 %v1177_v20, %v1780_v43  ;;  %v524_v26 = vstv %s1786_s16  ;;  %1194 = vtanh.f32 %v545_v15  ;;  %v564_v27 = vmul.f32 %v561_v19, %v1668_v2  ;;  %s1835_s16 = sld [smem:[#allocation9 + $0xc]] }
  0xaa   : >> { %v480_v28 = vadd.f32 %v476_v9, %v454_v7  ;;  %v503_v29 = vadd.f32 %v499_v18, %v477_v10  ;;  %v565_v30 = vmul.f32 %v561_v19, %v1671_v3  ;;  %v567_v31 = vstv %s1792_s30  ;;  %s1840_s30 = sld [smem:[#allocation3 + $0xe]] }
  0xab   : >> { %v502_v32 = vmul.f32 %v1179_v24, %v1780_v43  ;;  %v568_v33 = vadd.f32 %v567_v31, %v562_v22  ;;  %v569_v34 = vadd.f32 %v567_v31, %v563_v23  ;;  %v570_v35 = vadd.f32 %v567_v31, %v564_v27 }
  0xac   : >> { %v1181_v36 = vpop.eup %1180  ;;  %v504_v37 = vadd.f32 %v500_v21, %v478_v13  ;;  %v505_v38 = vadd.f32 %v501_v25, %v479_v17  ;;  %v571_v39 = vadd.f32 %v567_v31, %v565_v30  ;;  %v587_v40 = vstv %s1796_s11  ;;  %s1845_s11 = sld [smem:[#allocation9 + $0xd]] }
  0xad   : >> { %v1183_v41 = vpop.eup %1182  ;;  %v525_v42 = vmul.f32 %v1181_v36, %v524_v26  ;;  %1196 = vtanh.f32 %v568_v33  ;;  %v588_v44 = vmul.f32 %v587_v40, %v1662_v0  ;;  %v589_v45 = vmul.f32 %v587_v40, %v1665_v1 }
  0xae   : >> { %v1185_v43 = vpop.eup %1184  ;;  %v526_v46 = vmul.f32 %v1183_v41, %v524_v26  ;;  %1198 = vtanh.f32 %v569_v34  ;;  %v590_v47 = vmul.f32 %v587_v40, %v1668_v2  ;;  %v591_v48 = vmul.f32 %v587_v40, %v1671_v3 }
  0xaf   : >> { %v1187_v49 = vpop.eup %1186  ;;  %v506_v50 = vadd.f32 %v502_v32, %v480_v28  ;;  %v527_v51 = vmul.f32 %v1185_v43, %v524_v26  ;;  %1200 = vtanh.f32 %v570_v35  ;;  %v593_v52 = vstv %s1800_s18  ;;  %s1849_s18 = sld [smem:[#allocation7 + $0xe]] }
  0xb0   : >> { %v1189_v53 = vpop.eup %1188  ;;  %v528_v54 = vmul.f32 %v1187_v49, %v524_v26  ;;  %v550_v55 = vstv %s1803_s27  ;;  %1202 = vtanh.f32 %v571_v39  ;;  %v594_v56 = vadd.f32 %v593_v52, %v588_v44  ;;  %s1851_s27 = sld [smem:[#allocation3 + $0xf]] }
  0xb1   : >> { %v1191_v57 = vpop.eup %1190  ;;  %v595_v58 = vadd.f32 %v593_v52, %v589_v45  ;;  %v596_v59 = vadd.f32 %v593_v52, %v590_v47  ;;  %v529_v61 = vadd.f32 %v525_v42, %v503_v29  ;;  %v530_v62 = vadd.f32 %v526_v46, %v504_v37 }
  0xb2   : >> { %v1193_v60 = vpop.eup %1192  ;;  %v597_v63 = vadd.f32 %v593_v52, %v591_v48  ;;  %v531_v6 = vadd.f32 %v527_v51, %v505_v38  ;;  %v532_v7 = vadd.f32 %v528_v54, %v506_v50  ;;  %v551_v4 = vmul.f32 %v1189_v53, %v550_v55 }
  0xb3   : >> { %v1195_v5 = vpop.eup %1194  ;;  %1204 = vtanh.f32 %v594_v56  ;;  %v552_v8 = vmul.f32 %v1191_v57, %v550_v55  ;;  %v553_v9 = vmul.f32 %v1193_v60, %v550_v55  ;;  %v613_v10 = vstv %s1814_s25  ;;  %s1856_s25 = sld [smem:[#allocation7 + $0xf]] }
  0xb4   : >> { %1206 = vtanh.f32 %v595_v58  ;;  %v554_v11 = vmul.f32 %v1195_v5, %v550_v55  ;;  %v614_v12 = vmul.f32 %v613_v10, %v1662_v0  ;;  %v615_v13 = vmul.f32 %v613_v10, %v1665_v1 }
  0xb5   : >> { %1208 = vtanh.f32 %v596_v59  ;;  %v616_v14 = vmul.f32 %v613_v10, %v1668_v2  ;;  %v617_v15 = vmul.f32 %v613_v10, %v1671_v3  ;;  %v619_v16 = vstv %s1820_s6  ;;  %s1865_s6 = sld [smem:[#allocation9 + $0xe]] }
  0xb6   : >> { %1210 = vtanh.f32 %v597_v63  ;;  %v576_v18 = vstv %s1822_s8  ;;  %v620_v19 = vadd.f32 %v619_v16, %v614_v12  ;;  %v621_v20 = vadd.f32 %v619_v16, %v615_v13  ;;  %s1871_s8 = sld [smem:[#allocation3 + $0x10]] }
  0xb7   : >> { %v1197_v17 = vpop.eup %1196  ;;  %v639_v21 = vstv %s1825_s9  ;;  %v555_v23 = vadd.f32 %v551_v4, %v529_v61  ;;  %v622_v24 = vadd.f32 %v619_v16, %v616_v14  ;;  %v623_v25 = vadd.f32 %v619_v16, %v617_v15  ;;  %s1873_s9 = sld [smem:[#allocation7 + $0x10]] }
  0xb8   : >> { %v1199_v22 = vpop.eup %1198  ;;  %v640_v26 = vmul.f32 %v639_v21, %v1662_v0  ;;  %v556_v28 = vadd.f32 %v552_v8, %v530_v62  ;;  %v557_v29 = vadd.f32 %v553_v9, %v531_v6  ;;  %1212 = vtanh.f32 %v620_v19 }
  0xb9   : >> { %v1201_v27 = vpop.eup %1200  ;;  %v641_v30 = vmul.f32 %v639_v21, %v1665_v1  ;;  %v558_v32 = vadd.f32 %v554_v11, %v532_v7  ;;  %v577_v33 = vmul.f32 %v1197_v17, %v576_v18  ;;  %1214 = vtanh.f32 %v621_v20 }
  0xba   : >> { %v1203_v31 = vpop.eup %1202  ;;  %v642_v34 = vmul.f32 %v639_v21, %v1668_v2  ;;  %v578_v35 = vmul.f32 %v1199_v22, %v576_v18  ;;  %v579_v36 = vmul.f32 %v1201_v27, %v576_v18  ;;  %1216 = vtanh.f32 %v622_v24 }
  0xbb   : >> { %v645_v37 = vstv %s1828_s10  ;;  %v580_v38 = vmul.f32 %v1203_v31, %v576_v18  ;;  %1218 = vtanh.f32 %v623_v25  ;;  %v643_v39 = vmul.f32 %v639_v21, %v1671_v3  ;;  %s1879_s10 = sld [smem:[#allocation3 + $0x11]] }
  0xbc   : >> { %v646_v40 = vadd.f32 %v645_v37, %v640_v26  ;;  %v602_v42 = vstv %s1831_s13  ;;  %v647_v44 = vadd.f32 %v645_v37, %v641_v30  ;;  %v628_v43 = vstv %s1835_s16  ;;  %s1885_s13 = sld [smem:[#allocation7 + $0x11]]  ;;  %s1891_s16 = sld [smem:[#allocation9 + $0xf]] }
  0xbd   : >> { %v1205_v41 = vpop.eup %1204  ;;  %v648_v46 = vadd.f32 %v645_v37, %v642_v34  ;;  %v665_v47 = vstv %s1840_s30  ;;  %v581_v49 = vadd.f32 %v577_v33, %v555_v23  ;;  %v582_v50 = vadd.f32 %v578_v35, %v556_v28  ;;  %s1897_s30 = sld [smem:[#allocation9 + $0x10]] }
  0xbe   : >> { %v1207_v45 = vpop.eup %1206  ;;  %1220 = vtanh.f32 %v646_v40  ;;  %v583_v51 = vadd.f32 %v579_v36, %v557_v29  ;;  %v666_v52 = vmul.f32 %v665_v47, %v1662_v0  ;;  %v584_v54 = vadd.f32 %v580_v38, %v558_v32 }
  0xbf   : >> { %v1209_v48 = vpop.eup %1208  ;;  %v603_v55 = vmul.f32 %v1205_v41, %v602_v42  ;;  %v649_v56 = vadd.f32 %v645_v37, %v643_v39  ;;  %v667_v57 = vmul.f32 %v665_v47, %v1665_v1  ;;  %v604_v58 = vmul.f32 %v1207_v45, %v602_v42 }
  0xc0   : >> { %v1211_v53 = vpop.eup %1210  ;;  %1222 = vtanh.f32 %v647_v44  ;;  %v1863_v59 = vstv %s1845_s11  ;;  %v668_v60 = vmul.f32 %v665_v47, %v1668_v2  ;;  %v669_v61 = vmul.f32 %v665_v47, %v1671_v3  ;;  %s1900_s11 = sld [smem:[#allocation3 + $0x12]] }
  0xc1   : >> { %1224 = vtanh.f32 %v648_v46  ;;  %v671_v62 = vstv %s1849_s18  ;;  %v691_v63 = vstv %s1851_s27  ;;  %v605_v6 = vmul.f32 %v1209_v48, %v602_v42  ;;  %s1909_s18 = sld [smem:[#allocation7 + $0x12]]  ;;  %s1911_s27 = sld [smem:[#allocation3 + $0x13]] }
  0xc2   : >> { %v1213_v5 = vpop.eup %1212  ;;  %v606_v7 = vmul.f32 %v1211_v53, %v602_v42  ;;  %v672_v4 = vadd.f32 %v671_v62, %v666_v52  ;;  %v673_v8 = vadd.f32 %v671_v62, %v667_v57  ;;  %v607_v10 = vadd.f32 %v603_v55, %v581_v49 }
  0xc3   : >> { %v1215_v9 = vpop.eup %1214  ;;  %1226 = vtanh.f32 %v649_v56  ;;  %v674_v11 = vadd.f32 %v671_v62, %v668_v60  ;;  %v692_v12 = vmul.f32 %v691_v63, %v1662_v0  ;;  %v629_v14 = vmul.f32 %v1213_v5, %v628_v43 }
  0xc4   : >> { %v1217_v13 = vpop.eup %1216  ;;  %1228 = vtanh.f32 %v672_v4  ;;  %v693_v15 = vmul.f32 %v691_v63, %v1665_v1  ;;  %v697_v16 = vstv %s1856_s25  ;;  %v608_v18 = vadd.f32 %v604_v58, %v582_v50  ;;  %s1916_s25 = sld [smem:[#allocation9 + $0x11]] }
  0xc5   : >> { %v1219_v17 = vpop.eup %1218  ;;  %v675_v19 = vadd.f32 %v671_v62, %v669_v61  ;;  %1230 = vtanh.f32 %v673_v8  ;;  %v694_v20 = vmul.f32 %v691_v63, %v1668_v2  ;;  %v609_v21 = vadd.f32 %v605_v6, %v583_v51 }
  0xc6   : >> { %v610_v22 = vadd.f32 %v606_v7, %v584_v54  ;;  %v630_v23 = vmul.f32 %v1215_v9, %v628_v43  ;;  %v631_v24 = vmul.f32 %v1217_v13, %v628_v43  ;;  %v632_v26 = vmul.f32 %v1219_v17, %v628_v43 }
  0xc7   : >> { %1232 = vtanh.f32 %v674_v11  ;;  %v695_v27 = vmul.f32 %v691_v63, %v1671_v3  ;;  %v698_v28 = vadd.f32 %v697_v16, %v692_v12  ;;  %v633_v29 = vadd.f32 %v629_v14, %v607_v10 }
  0xc8   : >> { %v1221_v25 = vpop.eup %1220  ;;  %v1883_v30 = vstv %s1865_s6  ;;  %v699_v31 = vadd.f32 %v697_v16, %v693_v15  ;;  %1234 = vtanh.f32 %v675_v19  ;;  %v700_v32 = vadd.f32 %v697_v16, %v694_v20  ;;  %s1921_s6 = sld [smem:[#allocation7 + $0x13]] }
  0xc9   : >> { %v717_v33 = vstv %s1871_s8  ;;  %v723_v34 = vstv %s1873_s9  ;;  %v634_v36 = vadd.f32 %v630_v23, %v608_v18  ;;  %v635_v37 = vadd.f32 %v631_v24, %v609_v21  ;;  %v1277_v24 = vld [vmem:[%s1659_s7 + $0x10] sm:$0xff]  ;;  %s1932_s8 = sld [smem:[#allocation9 + $0x12]]  ;;  %s819_s9 = scalar_lea.vmem %s1648_s14, %s962_s24 [#allocation11] }
  0xca   : >> { %v1223_v35 = vpop.eup %1222  ;;  %v655_v38 = vmul.f32 %v1221_v25, %v1863_v59  ;;  %v718_v39 = vmul.f32 %v717_v33, %v1662_v0  ;;  %v636_v41 = vadd.f32 %v632_v26, %v610_v22  ;;  %v701_v42 = vadd.f32 %v697_v16, %v695_v27  ;;  %v1276_v22 = vld [vmem:[%s1659_s7 + $0x8] sm:$0xff]  ;;  %v1278_v26 = vld [vmem:[%s1659_s7 + $0x18] sm:$0xff]  ;;  %s1024_s24 = smul.u32 (%p287_p12), 4608, %s1502_s3  ;;  %s1361_s3 = scalar_lea.vmem (%p287_p12), %s1360_s15, 9216 }
  0xcb   : >> { %v1225_v40 = vpop.eup %1224  ;;  %1236 = vtanh.f32 %v698_v28  ;;  %v719_v44 = vmul.f32 %v717_v33, %v1665_v1  ;;  %v720_v45 = vmul.f32 %v717_v33, %v1668_v2  ;;  %v721_v43 = vmul.f32 %v717_v33, %v1671_v3 }
  0xcc   : >> { %1238 = vtanh.f32 %v699_v31  ;;  %v724_v46 = vadd.f32 %v723_v34, %v718_v39  ;;  %v656_v48 = vmul.f32 %v1223_v35, %v1863_v59  ;;  %v743_v50 = vstv %s1879_s10  ;;  %s838_s10 = sshll.u32 (%p287_p12), %s1648_s14, 4  ;;  %s1949_s10 = int_to_ptr.vmem [resolvable:$true] %s838_s10 }
  0xcd   : >> { %v1227_v47 = vpop.eup %1226  ;;  %1240 = vtanh.f32 %v700_v32  ;;  %v725_v49 = vadd.f32 %v723_v34, %v719_v44  ;;  %v657_v52 = vmul.f32 %v1225_v40, %v1863_v59  ;;  %v659_v53 = vadd.f32 %v655_v38, %v633_v29  ;;  %v1279_v40 = vld [vmem:[%s1659_s7] sm:$0xff]  ;;  %s1017_s7 = sld [smem:[#allocation9 + $0x13]]  ;;  %p1362_p4 = scmp.lt.s32.totalorder (%p287_p12), %s1949_s10, %s1360_s15 }
  0xce   : >> { %v1229_v51 = vpop.eup %1228  ;;  %v726_v54 = vadd.f32 %v723_v34, %v720_v45  ;;  %v744_v55 = vmul.f32 %v743_v50, %v1662_v0  ;;  %1242 = vtanh.f32 %v701_v42  ;;  %v727_v57 = vadd.f32 %v723_v34, %v721_v43 }
  0xcf   : >> { %v1231_v56 = vpop.eup %1230  ;;  %v745_v58 = vmul.f32 %v743_v50, %v1665_v1  ;;  %v746_v60 = vmul.f32 %v743_v50, %v1668_v2  ;;  %v658_v61 = vmul.f32 %v1227_v47, %v1863_v59  ;;  %1244 = vtanh.f32 %v724_v46 }
  0xd0   : >> { %v747_v62 = vmul.f32 %v743_v50, %v1671_v3  ;;  %v749_v63 = vstv %s1885_s13  ;;  %v660_v6 = vadd.f32 %v656_v48, %v634_v36  ;;  %v681_v7 = vmul.f32 %v1229_v51, %v1883_v30 }
  0xd1   : >> { %v1233_v5 = vpop.eup %1232  ;;  %1246 = vtanh.f32 %v725_v49  ;;  %v750_v4 = vadd.f32 %v749_v63, %v744_v55  ;;  %v682_v1 = vmul.f32 %v1231_v56, %v1883_v30  ;;  %v751_v2 = vadd.f32 %v749_v63, %v745_v58 }
  0xd2   : >> { %1248 = vtanh.f32 %v726_v54  ;;  %v752_v59 = vadd.f32 %v749_v63, %v746_v60  ;;  %v1235_v8 = vpop.eup %1234  ;;  %v706_v3 = vstv %s1891_s16  ;;  %v753_v9 = vadd.f32 %v749_v63, %v747_v62 }
  0xd3   : >> { %1250 = vtanh.f32 %v727_v57  ;;  %v661_v10 = vadd.f32 %v657_v52, %v635_v37  ;;  %v662_v11 = vadd.f32 %v658_v61, %v636_v41  ;;  %v683_v12 = vmul.f32 %v1233_v5, %v1883_v30 }
  0xd4   : >> { %1252 = vtanh.f32 %v750_v4  ;;  %v685_v14 = vadd.f32 %v681_v7, %v659_v53  ;;  %v732_v15 = vstv %s1897_s30  ;;  %v769_v16 = vstv %s1900_s11  ;;  %s1947_s30 = scalar_lea.hbm (%p287_p12), %s1998_s5, %s1024_s24  ;;  %s825_s11 = scalar_lea.sflag (%p287_p12), [#allocation5], %s1638_s17 }
  0xd5   : >> { %v1237_v13 = vpop.eup %1236  ;;  %1254 = vtanh.f32 %v751_v2  ;;  %v684_v18 = vmul.f32 %v1235_v8, %v1883_v30  ;;  %v686_v19 = vadd.f32 %v682_v1, %v660_v6  ;;  %v770_v20 = vmul.f32 %v769_v16, %v1662_v0 }
  0xd6   : >> { %v1239_v17 = vpop.eup %1238  ;;  %1256 = vtanh.f32 %v752_v59  ;;  %v771_v23 = vmul.f32 %v1276_v22, %v769_v16  ;;  %v772_v25 = vmul.f32 %v1277_v24, %v769_v16  ;;  %v773_v27 = vmul.f32 %v1278_v26, %v769_v16 }
  0xd7   : >> { %v1241_v21 = vpop.eup %1240  ;;  %1258 = vtanh.f32 %v753_v9  ;;  %v687_v28 = vadd.f32 %v683_v12, %v661_v10  ;;  %v707_v29 = vmul.f32 %v1237_v13, %v706_v3  ;;  %v775_v31 = vstv %s1909_s18  ;;  %s1355_s18 = scalar_lea.vmem (%p287_p12), %s1949_s10, 4608 }
  0xd8   : >> { %v795_v32 = vstv %s1911_s27  ;;  %v1243_v33 = vpop.eup %1242  ;;  %v708_v30 = vmul.f32 %v1239_v17, %v706_v3  ;;  %v776_v34 = vadd.f32 %v775_v31, %v770_v20  ;;  %v777_v35 = vadd.f32 %v775_v31, %v771_v23  ;;  %p1356_p0 = scmp.ne.s32.totalorder (%p287_p12), %s1949_s10, %s1355_s18  ;;  %p1363_p6 = scmp.lt.s32.totalorder (%p287_p12), %s1361_s3, %s1355_s18 }
  0xd9   : >> { %v778_v36 = vadd.f32 %v775_v31, %v772_v25  ;;  %v1245_v0 = vpop.eup %1244  ;;  %v688_v37 = vadd.f32 %v684_v18, %v662_v11  ;;  %v709_v38 = vmul.f32 %v1241_v21, %v706_v3  ;;  %v779_v39 = vadd.f32 %v775_v31, %v773_v27 }
  0xda   : >> { %v796_v41 = vmul.f32 %v1279_v40, %v795_v32  ;;  %v758_v44 = vstv %s1916_s25  ;;  %1260 = vtanh.f32 %v776_v34  ;;  %v797_v45 = vmul.f32 %v1276_v22, %v795_v32  ;;  %p1357_p3 = pnand (%p287_p12), %p1356_p0, %p1582_p9  ;;  %p1364_p8 = por (%p287_p12), %p1363_p6, %p1362_p4 }
  0xdb   : >> { %v1247_v42 = vpop.eup %1246  ;;  %v798_v43 = vmul.f32 %v1277_v24, %v795_v32  ;;  %v710_v47 = vmul.f32 %v1243_v33, %v706_v3  ;;  %v711_v48 = vadd.f32 %v707_v29, %v685_v14  ;;  %1262 = vtanh.f32 %v777_v35 }
  0xdc   : >> { %v1249_v46 = vpop.eup %1248  ;;  %v799_v49 = vmul.f32 %v1278_v26, %v795_v32  ;;  %v712_v51 = vadd.f32 %v708_v30, %v686_v19  ;;  %v733_v52 = vmul.f32 %v1245_v0, %v732_v15  ;;  %1264 = vtanh.f32 %v778_v36  ;;  %p1358_p2 = pneg (%p287_p12), %p1357_p3 }
  0xdd   : >> { %v1251_v50 = vpop.eup %1250  ;;  %v801_v53 = vstv %s1921_s6  ;;  %v713_v55 = vadd.f32 %v709_v38, %v687_v28  ;;  %v734_v56 = vmul.f32 %v1247_v42, %v732_v15  ;;  %1266 = vtanh.f32 %v779_v39 }
  0xde   : >> { %v1253_v54 = vpop.eup %1252  ;;  %v802_v57 = vadd.f32 %v801_v53, %v796_v41  ;;  %v735_v60 = vmul.f32 %v1249_v46, %v732_v15  ;;  %v803_v61 = vadd.f32 %v801_v53, %v797_v45  ;;  %v804_v62 = vadd.f32 %v801_v53, %v798_v43  ;;  %p1365_p1 = pnand (%p287_p12), %p1364_p8, %p1358_p2 }
  0xdf   : >> { %v1255_v58 = vpop.eup %1254  ;;  %v805_v63 = vadd.f32 %v801_v53, %v799_v49  ;;  %v714_v6 = vadd.f32 %v710_v47, %v688_v37  ;;  %v736_v7 = vmul.f32 %v1251_v50, %v732_v15  ;;  %v737_v1 = vadd.f32 %v733_v52, %v711_v48 }
  0xe0   : >> { %v1257_v5 = vpop.eup %1256  ;;  %1268 = vtanh.f32 %v802_v57  ;;  %v759_v2 = vmul.f32 %v1253_v54, %v758_v44  ;;  %v738_v59 = vadd.f32 %v734_v56, %v712_v51  ;;  %v760_v8 = vmul.f32 %v1255_v58, %v758_v44 }
  0xe1   : >> { %v1259_v4 = vpop.eup %1258  ;;  %1270 = vtanh.f32 %v803_v61  ;;  %v739_v3 = vadd.f32 %v735_v60, %v713_v55  ;;  %v761_v9 = vmul.f32 %v1257_v5, %v758_v44  ;;  %v784_v10 = vstv %s1932_s8 }
  0xe2   : >> { %1272 = vtanh.f32 %v804_v62  ;;  %v740_v11 = vadd.f32 %v736_v7, %v714_v6  ;;  %v762_v12 = vmul.f32 %v1259_v4, %v758_v44  ;;  %v763_v14 = vadd.f32 %v759_v2, %v737_v1 }
  0xe3   : >> { %1274 = vtanh.f32 %v805_v63  ;;  %v764_v17 = vadd.f32 %v760_v8, %v738_v59  ;;  %v765_v19 = vadd.f32 %v761_v9, %v739_v3  ;;  %v810_v24 = vstv %s1017_s7 }
  0xe4   : >> { %v1261_v13 = vpop.eup %1260  ;;  %v766_v22 = vadd.f32 %v762_v12, %v740_v11 }
  0xe5   : >> { %v1263_v16 = vpop.eup %1262  ;;  %v785_v15 = vmul.f32 %v1261_v13, %v784_v10 }
  0xe6   : >> { %v1265_v18 = vpop.eup %1264  ;;  %v786_v20 = vmul.f32 %v1263_v16, %v784_v10 }
  0xe7   : >> { %v1267_v21 = vpop.eup %1266  ;;  %v787_v23 = vmul.f32 %v1265_v18, %v784_v10  ;;  %v789_v26 = vadd.f32 %v785_v15, %v763_v14 }
  0xe8   : >> { %v788_v25 = vmul.f32 %v1267_v21, %v784_v10  ;;  %v790_v28 = vadd.f32 %v786_v20, %v764_v17 }
  0xe9   : >> { %v791_v31 = vadd.f32 %v787_v23, %v765_v19 }
  0xea   : >> { %v1269_v27 = vpop.eup %1268  ;;  %v792_v30 = vadd.f32 %v788_v25, %v766_v22 }
  0xeb   : >> { %v1271_v29 = vpop.eup %1270  ;;  %v811_v32 = vmul.f32 %v1269_v27, %v810_v24 }
  0xec   : >> { %v1273_v33 = vpop.eup %1272  ;;  %v812_v34 = vmul.f32 %v1271_v29, %v810_v24  ;;  %289 = sbr.rel (!%p287_p12) target bundleno = 110 (0x6e), region = 107 }
  0xed   : >> { %v1275_v35 = vpop.eup %1274  ;;  %v813_v36 = vmul.f32 %v1273_v33, %v810_v24  ;;  %v815_v0 = vadd.f32 %v811_v32, %v789_v26 }
  0xee   : >> { %v814_v37 = vmul.f32 %v1275_v35, %v810_v24  ;;  %v816_v38 = vadd.f32 %v812_v34, %v790_v28 }
  0xef   : >> { %v817_v39 = vadd.f32 %v813_v36, %v791_v31  ;;  %820 = vst [vmem:[%s819_s9] sm:$0xff] %v815_v0 }
  0xf0   : >> { %v818_v40 = vadd.f32 %v814_v37, %v792_v30  ;;  %821 = vst [vmem:[%s819_s9 + $0x8] sm:$0xff] %v816_v38 }
  0xf1   : >> { %822 = vst [vmem:[%s819_s9 + $0x10] sm:$0xff] %v817_v39 }
  0xf2   : >> { %823 = vst [vmem:[%s819_s9 + $0x18] sm:$0xff] %v818_v40 }
  0xf3   : > { %1368 = shalt.err (!%p1365_p1)
}
  0xf4   : > { %s1369_s14 = scalar_lea.hbm %s1947_s30, 4608  ;;  %s1373_s6 = scalar_lea.hbm %s1998_s5, 9216 }
  0xf5   : > { %p1370_p5 = scmp.ne.s32.totalorder %s1947_s30, %s1369_s14  ;;  %p1374_p10 = scmp.lt.u32.totalorder %s1947_s30, %s1998_s5 }
  0xf6   : > { %p1375_p11 = scmp.lt.u32.totalorder %s1373_s6, %s1369_s14  ;;  %p1377_p0 = scmp.lt.u32.totalorder %s1369_s14, %s1947_s30 }
  0xf7   : > { %p1371_p13 = pnand %p1370_p5, %p1582_p9 }
  0xf8   : > { %p1376_p12 = por %p1375_p11, %p1374_p10 }
  0xf9   : > { %p1372_p7 = pneg %p1371_p13 }
  0xfa   : > { %p1378_p3 = por %p1377_p0, %p1376_p12 }
  0xfc   : > { %p1379_p2 = pnand %p1378_p3, %p1372_p7 }
  0xfe   : > { %1382 = shalt.err (!%p1379_p2)
}
  0xff   : > { %s1446_s9 = smov 128   ;;  %s1447_s24 = smov 8  }
 0x100   : > { %1041 = dma.vmem_to_hbm [thread:$0]  (%p1582_p9), %s1949_s10, 4608, %s1947_s30, %s825_s11, %s1446_s9, %s1446_s9, %s1447_s24  }
 0x101 PF: > { %s853_s13 = sand.u32 1, %s1421_s20   ;;  %p2015_p4 = scmp.ne.s32.totalorder %s2003_s26, 0 }
 0x102   : > { %p2016_p6 = scmp.ge.s32.totalorder %s1433_s23, 2  ;;  %s854_s16 = scalar_lea.sflag [#allocation5], %s853_s13 }
 0x104   : > { %p1058_p8 = pnand %p2016_p6, %p2015_p4 }
 0x106   : > { %1416 = dma.done.wait (!%p1058_p8), %s854_s16, 4608  }
 0x107   : > { %1418 = vsyncadd (!%p1058_p8), %s854_s16, 4294962688  ;;  %p21_p1 = scmp.ge.s32.totalorder %s1568_s19, 4   ;;  %s2017_s20 = smov %s1425_s21 }
 0x108   : > { %s2018_s21 = smov %s1429_s22  ;;  %s2019_s22 = smov %s1578_s28 }
 0x109   : > { %s2020_s23 = smov %s1568_s19  ;;  %23 = sbr.rel (!%p21_p1) target bundleno = 9 (0x9), region = 118 }
 0x110   :  { %859 = vsyncpa [#allocation4], 1 }
 0x111   :  { %861 = vsyncpa [#allocation4 + $0x1], 1 }
 0x112   :  { %862 = vsyncpa [#allocation5], 1 }
 0x113   :  { %864 = vsyncpa [#allocation5 + $0x1], 1 }
 0x114   :  { %865 = vsyncpa [#allocation6], 1 }
 0x115   :  { %867 = vsyncpa [#allocation6 + $0x1], 1 }
 0x116   :  { %868 = vsyncpa [#allocation8], 1 }

</bundles_post_ra>
